<compile_context>
chip_gen: v7x
topology: tpu7x:2x2x1
jax: 0.10.0
libtpu: 0.0.40
codegen_flags: <defaults>
</compile_context>

<pallas_src>
import functools

import jax
import jax.numpy as jnp
from jax.experimental import pallas as pl
from jax.experimental.pallas import tpu as pltpu


NEG_SLOPE = 0.01  # nn.LeakyReLU default


def _leaky(v):
    return jnp.where(v > 0, v, NEG_SLOPE * v)


# ----------------------------------- kernel -----------------------------------

def _kae_kernel(x_ref,
                we1, be1, we2, be2,            # encoder fc1 / fc2
                wfold, bfold,                   # fused (enc fc3 @ dyn^s @ dec fc1)
                wd2, bd2, wd3, bd3,             # decoder fc2 / fc3
                out_ref, d1_scratch,
                *, steps, tile_b, hdim, mn, compute_dtype):
    """Forward pass for one batch tile.

    x_ref      : (tile_b, mn)  f32
    wfold      : (H, S1*H)     -- [:, s*H:(s+1)*H] = we3 @ Wdyn^s @ wd1
    bfold      : (1, S1*H)
    out_ref    : (S1, tile_b, mn)  step-major output block
    d1_scratch : (S1*tile_b, H) VMEM, step-major rows
    """
    S1 = steps + 1
    cd = compute_dtype

    # ---- encoder fc1 -> leaky, fc2 -> leaky (f32 accumulate, f32 LeakyReLU) ----
    x = x_ref[...].astype(cd)
    h = _leaky(jnp.dot(x, we1[...], preferred_element_type=jnp.float32) + be1[...])
    h = _leaky(jnp.dot(h.astype(cd), we2[...],
                       preferred_element_type=jnp.float32) + be2[...])

    # ---- all steps' (enc fc3 + dynamics^s + dec fc1) in ONE lane-dense matmul ----
    d1_cat = _leaky(jnp.dot(h.astype(cd), wfold[...],
                            preferred_element_type=jnp.float32) + bfold[...])

    # scatter per-step lane slices into step-major rows (static, aligned slices)
    for s in range(S1):
        d1_scratch[s * tile_b:(s + 1) * tile_b, :] = (
            d1_cat[:, s * hdim:(s + 1) * hdim].astype(d1_scratch.dtype))

    # ---- batched decoder fc2 / fc3 over all steps at once ----
    d1 = d1_scratch[...]
    d2 = _leaky(jnp.dot(d1, wd2[...], preferred_element_type=jnp.float32) + bd2[...])
    d3 = _leaky(jnp.dot(d2.astype(cd), wd3[...],
                        preferred_element_type=jnp.float32) + bd3[...])

    # single contiguous, step-major, lane-dense store (reshape is layout-free
    # because tile_b is a multiple of the sublane tile)
    out_ref[...] = d3.reshape(S1, tile_b, mn).astype(out_ref.dtype)


# ----------------------------------- wrapper -----------------------------------

def _fold_dynamics(params, steps):
    """Concatenated fold:  Wfold[:, s*H:(s+1)*H] = we3 @ Wdyn^s @ wd1.

    Ordering matches the PyTorch output list: s = 1..steps (advanced latents)
    followed by s = 0 (decode of the raw latent z).  Computed in f32.
    """
    we3, be3 = params["we3"], params["be3"]      # (H, b), (1, b)
    wd1, bd1 = params["wd1"], params["bd1"]      # (b, H), (1, H)
    wdyn_t = params["wdyn_t"]                    # (b, b), q_next = q @ wdyn_t
    b = wdyn_t.shape[0]

    powers = []
    A = jnp.eye(b, dtype=jnp.float32)
    for _ in range(steps):
        A = A @ wdyn_t
        powers.append(A)
    powers.append(jnp.eye(b, dtype=jnp.float32))  # final decode of raw z

    wf = [we3 @ A @ wd1 for A in powers]          # each (H, H)
    bf = [be3 @ A @ wd1 + bd1 for A in powers]    # each (1, H)
    return jnp.concatenate(wf, axis=1), jnp.concatenate(bf, axis=1)


def _vmem_capacity_bytes():
    """Per-core VMEM capacity; conservative fallback if the query fails."""
    try:
        info = pltpu.get_tpu_info()
        cap = int(getattr(info, "vmem_capacity_bytes", 0))
        if cap > 0:
            return cap
    except Exception:
        pass
    return 64 * 1024 * 1024  # v7x per-TensorCore VMEM (smallest current gen)


def _const_spec(a):
    """Full-array, grid-resident weight block; single-buffered when supported."""
    index_map = lambda i, _nd=a.ndim: (0,) * _nd
    try:
        return pl.BlockSpec(a.shape, index_map, pipeline_mode=pl.Buffered(1))
    except Exception:  # older jax without pipeline_mode / Buffered
        return pl.BlockSpec(a.shape, index_map)


def _pick_batch_tile(B_pad, S1, mn, H, *, out_bytes, in_bytes, budget_bytes, align):
    """Largest batch tile (multiple of `align`, dividing B_pad) whose
    double-buffered input/output blocks plus d1 scratch fit the VMEM budget,
    capped so the grid has >= 2 steps when possible (v7x megacore)."""
    per_row = (2 * mn * in_bytes            # input block  (double-buffered)
               + 2 * S1 * mn * out_bytes    # output block (double-buffered)
               + S1 * H * 4)                # d1 scratch   (single copy)
    t_budget = max(align, (budget_bytes // per_row) // align * align)
    if B_pad >= 2 * align:
        t_cap = max(align, (B_pad // 2) // align * align)   # >= 2 grid steps
    else:
        t_cap = B_pad
    t_max = min(B_pad, t_cap, t_budget)
    best = align
    t = align
    while t <= t_max:
        if B_pad % t == 0:
            best = t
        t += align
    return best


def koopman_ae_forward(x, params, *, m, n, steps,
                       compute_dtype=jnp.float32, out_dtype=jnp.float32):
    """mode='forward' of koopmanAE.  Returns (out, out_back) like PyTorch."""
    B = x.shape[0]
    mn = m * n
    H = params["we1"].shape[1]
    S1 = steps + 1

    out_bytes = jnp.dtype(out_dtype).itemsize
    # sublane alignment of the batch axis: 8 rows for 4-byte out, 16 for 2-byte
    align = max(8, 32 // out_bytes)

    x_flat = x.reshape(B, mn).astype(jnp.float32)
    B_pad = max(align, ((B + align - 1) // align) * align)
    if B_pad != B:
        x_flat = jnp.pad(x_flat, ((0, B_pad - B), (0, 0)))

    # fold (encoder fc3 -> dynamics^s -> decoder fc1) into one (H, S1*H) weight
    wfold_cat, bfold_cat = _fold_dynamics(params, steps)

    cd = compute_dtype
    flat_params = (
        params["we1"].astype(cd), params["be1"].astype(jnp.float32),
        params["we2"].astype(cd), params["be2"].astype(jnp.float32),
        wfold_cat.astype(cd), bfold_cat.astype(jnp.float32),
        params["wd2"].astype(cd), params["bd2"].astype(jnp.float32),
        params["wd3"].astype(cd), params["bd3"].astype(jnp.float32),
    )
    weight_bytes = sum(int(a.size) * a.dtype.itemsize for a in flat_params)

    vmem_cap = _vmem_capacity_bytes()
    # ~3/8 of VMEM for pipelined blocks (~24 MiB on v7x, ~48 MiB on v5e/v6e),
    # leaving headroom for weights + compiler scratch.
    budget = max(1 << 20, (vmem_cap * 3) // 8 - 2 * weight_bytes)
    tile_b = _pick_batch_tile(B_pad, S1, mn, H,
                              out_bytes=out_bytes, in_bytes=4,
                              budget_bytes=budget, align=align)
    num_tiles = B_pad // tile_b

    grid_spec = pltpu.PrefetchScalarGridSpec(
        num_scalar_prefetch=0,
        grid=(num_tiles,),
        in_specs=[pl.BlockSpec((tile_b, mn), lambda i: (i, 0))]
                 + [_const_spec(a) for a in flat_params],
        # step-major 3-D output block: wrapper reshape below is free
        out_specs=pl.BlockSpec((S1, tile_b, mn), lambda i: (0, i, 0)),
        scratch_shapes=[pltpu.VMEM((S1 * tile_b, H), cd)],
    )

    out = pl.pallas_call(
        functools.partial(_kae_kernel, steps=steps, tile_b=tile_b,
                          hdim=H, mn=mn, compute_dtype=cd),
        out_shape=jax.ShapeDtypeStruct((S1, B_pad, mn), out_dtype),
        grid_spec=grid_spec,
        compiler_params=pltpu.CompilerParams(
            dimension_semantics=("parallel",),
            vmem_limit_bytes=int((vmem_cap * 3) // 4)),
    )(x_flat, *flat_params)

    # already step-major / batch-contiguous: drop pad rows, split spatial dims
    frames = out[:, :B, :].reshape(S1, B, 1, m, n)
    out_list = [frames[s] for s in range(S1)]
    out_back = []  # mode='forward' never fills out_back
    # TODO(synk): mode='backward' / mode='Linear' would reuse the same kernel
    # with the back-dynamics weight folded in; only mode='forward' is built.
    return out_list, out_back


# ------------------------- deterministic parameter init -------------------------

def _xavier_normal_t(key, in_f, out_f):
    """PyTorch xavier_normal_ on a (out_f, in_f) weight, returned transposed."""
    std = (2.0 / (in_f + out_f)) ** 0.5
    w = jax.random.normal(key, (out_f, in_f), dtype=jnp.float32) * std
    return w.T  # (in_f, out_f)


def init_koopman_params(key, m, n, b, alpha=1, init_scale=1.0):
    mn = m * n
    H = 64 * alpha
    keys = jax.random.split(key, 8)

    # encoder
    we1 = _xavier_normal_t(keys[0], mn, H)
    we2 = _xavier_normal_t(keys[1], H, H)
    we3 = _xavier_normal_t(keys[2], H, b)
    be1 = jnp.zeros((1, H), jnp.float32)
    be2 = jnp.zeros((1, H), jnp.float32)
    be3 = jnp.zeros((1, b), jnp.float32)

    # dynamics: gaussian_init_ (std = 1/b) -> orthogonalize via SVD -> scale
    w0 = jax.random.normal(keys[3], (b, b), dtype=jnp.float32) * (1.0 / b)
    U, _, Vt = jnp.linalg.svd(w0)
    wdyn = (U @ Vt) * init_scale       # PyTorch stores Linear weight as (out, in)
    wdyn_t = wdyn.T                    # kernel/reference compute q @ W.T

    # back-dynamics (not used in forward mode, built for completeness)
    wback = jnp.linalg.pinv(wdyn.T)
    wback_t = wback.T

    # decoder
    wd1 = _xavier_normal_t(keys[4], b, H)
    wd2 = _xavier_normal_t(keys[5], H, H)
    wd3 = _xavier_normal_t(keys[6], H, mn)
    bd1 = jnp.zeros((1, H), jnp.float32)
    bd2 = jnp.zeros((1, H), jnp.float32)
    bd3 = jnp.zeros((1, mn), jnp.float32)

    return dict(we1=we1, be1=be1, we2=we2, be2=be2, we3=we3, be3=be3,
                wdyn_t=wdyn_t, wback_t=wback_t,
                wd1=wd1, bd1=bd1, wd2=wd2, bd2=bd2, wd3=wd3, bd3=bd3)


# ------------------------------ pure-JAX reference ------------------------------
# Faithful (un-folded, sequential) translation of the PyTorch forward; used to
# verify that the algebraic fold in the kernel matches the original semantics.

def _reference_forward(x, p, *, m, n, steps):
    B = x.shape[0]
    xf = x.reshape(B, m * n)
    h = _leaky(xf @ p["we1"] + p["be1"])
    h = _leaky(h @ p["we2"] + p["be2"])
    z = h @ p["we3"] + p["be3"]

    def dec(q):
        d = _leaky(q @ p["wd1"] + p["bd1"])
        d = _leaky(d @ p["wd2"] + p["bd2"])
        d = _leaky(d @ p["wd3"] + p["bd3"])
        return d.reshape(B, 1, m, n)

    out = []
    q = z
    for _ in range(steps):
        q = q @ p["wdyn_t"]
        out.append(dec(q))
    out.append(dec(z))
    return out


# ------------------------------------- main --------------------------------------

if __name__ == "__main__":
    m, n, b = 16, 16, 16
    steps, steps_back = 3, 3
    batch = 2

    key = jax.random.PRNGKey(0)
    k_param, k_x = jax.random.split(key)
    params = init_koopman_params(k_param, m, n, b, alpha=1, init_scale=1.0)

    x = jax.random.normal(k_x, (batch, 1, m, n), dtype=jnp.float32)  # NCHW

    ref_list = _reference_forward(x, params, m=m, n=n, steps=steps)

    # --- f32 path: tight check against the sequential (un-folded) reference ---
    out_list, out_back = koopman_ae_forward(x, params, m=m, n=n, steps=steps)
    out_list = [jax.block_until_ready(o) for o in out_list]
    assert len(out_list) == steps + 1 and len(out_back) == 0
    for got, ref in zip(out_list, ref_list):
        assert got.shape == (batch, 1, m, n)
        assert jnp.allclose(got, ref, atol=1e-4, rtol=1e-4)

    # --- bf16 weights/activations + bf16 output (v5e/v6e/v7x fast path) ---
    # tolerance deliberately loosened for bf16 rounding (f32 accumulation kept)
    out_bf, _ = koopman_ae_forward(x, params, m=m, n=n, steps=steps,
                                   compute_dtype=jnp.bfloat16,
                                   out_dtype=jnp.bfloat16)
    out_bf = [jax.block_until_ready(o) for o in out_bf]
    for got, ref in zip(out_bf, ref_list):
        assert got.shape == (batch, 1, m, n)
        assert jnp.allclose(got.astype(jnp.float32), ref, atol=1e-1, rtol=1e-1)

    print("KERNEL_OK")
</pallas_src>

<mosaic_0001>
module attributes {stable_mosaic.version = 11 : i64} {
  func.func @_kae_kernel(%arg0: i32, %arg1: memref<8x256xf32, #tpu.memory_space<vmem>>, %arg2: memref<256x64xf32, #tpu.memory_space<vmem>>, %arg3: memref<1x64xf32, #tpu.memory_space<vmem>>, %arg4: memref<64x64xf32, #tpu.memory_space<vmem>>, %arg5: memref<1x64xf32, #tpu.memory_space<vmem>>, %arg6: memref<64x256xf32, #tpu.memory_space<vmem>>, %arg7: memref<1x256xf32, #tpu.memory_space<vmem>>, %arg8: memref<64x64xf32, #tpu.memory_space<vmem>>, %arg9: memref<1x64xf32, #tpu.memory_space<vmem>>, %arg10: memref<64x256xf32, #tpu.memory_space<vmem>>, %arg11: memref<1x256xf32, #tpu.memory_space<vmem>>, %arg12: memref<4x8x256xf32, #tpu.memory_space<vmem>>, %arg13: memref<32x64xf32, #tpu.memory_space<vmem>>) attributes {dimension_semantics = [#tpu.dimension_semantics<parallel>], iteration_bounds = array<i64: 1>, scalar_prefetch = 0 : i64, scratch_operands = 1 : i64, tpu.core_type = #tpu.core_type<tc>, window_params = [{transform_indices = @transform_0, window_bounds = array<i64: 8, 256>}, {pipeline_mode = #tpu.pipeline_mode<synchronous>, transform_indices = @transform_1, window_bounds = array<i64: 256, 64>}, {pipeline_mode = #tpu.pipeline_mode<synchronous>, transform_indices = @transform_2, window_bounds = array<i64: 1, 64>}, {pipeline_mode = #tpu.pipeline_mode<synchronous>, transform_indices = @transform_3, window_bounds = array<i64: 64, 64>}, {pipeline_mode = #tpu.pipeline_mode<synchronous>, transform_indices = @transform_4, window_bounds = array<i64: 1, 64>}, {pipeline_mode = #tpu.pipeline_mode<synchronous>, transform_indices = @transform_5, window_bounds = array<i64: 64, 256>}, {pipeline_mode = #tpu.pipeline_mode<synchronous>, transform_indices = @transform_6, window_bounds = array<i64: 1, 256>}, {pipeline_mode = #tpu.pipeline_mode<synchronous>, transform_indices = @transform_7, window_bounds = array<i64: 64, 64>}, {pipeline_mode = #tpu.pipeline_mode<synchronous>, transform_indices = @transform_8, window_bounds = array<i64: 1, 64>}, {pipeline_mode = #tpu.pipeline_mode<synchronous>, transform_indices = @transform_9, window_bounds = array<i64: 64, 256>}, {pipeline_mode = #tpu.pipeline_mode<synchronous>, transform_indices = @transform_10, window_bounds = array<i64: 1, 256>}, {transform_indices = @transform_11, window_bounds = array<i64: 4, 8, 256>}]} {
    %c0 = arith.constant 0 : index
    %c0_0 = arith.constant 0 : index
    %0 = vector.load %arg1[%c0, %c0_0] : memref<8x256xf32, #tpu.memory_space<vmem>>, vector<8x256xf32>
    %c0_1 = arith.constant 0 : index
    %c0_2 = arith.constant 0 : index
    %1 = vector.load %arg2[%c0_1, %c0_2] : memref<256x64xf32, #tpu.memory_space<vmem>>, vector<256x64xf32>
    %cst = arith.constant dense<0.000000e+00> : vector<8x64xf32>
    %2 = tpu.matmul %0, %1, %cst {dimension_numbers = #tpu.dot_dimension_numbers<[1], [0], [0], [1], [0, 0, 1, 1], [], []>} : vector<8x256xf32>, vector<256x64xf32>, vector<8x64xf32> -> vector<8x64xf32>
    %c0_3 = arith.constant 0 : index
    %c0_4 = arith.constant 0 : index
    %3 = vector.load %arg3[%c0_3, %c0_4] : memref<1x64xf32, #tpu.memory_space<vmem>>, vector<1x64xf32>
    %4 = vector.broadcast %3 : vector<1x64xf32> to vector<8x64xf32>
    %5 = arith.addf %2, %4 : vector<8x64xf32>
    %cst_5 = arith.constant 0.000000e+00 : f32
    %6 = vector.broadcast %cst_5 : f32 to vector<8x64xf32>
    %7 = arith.cmpf ogt, %5, %6 : vector<8x64xf32>
    %cst_6 = arith.constant 0.00999999977 : f32
    %8 = vector.broadcast %cst_6 : f32 to vector<8x64xf32>
    %9 = arith.mulf %8, %5 : vector<8x64xf32>
    %10 = arith.select %7, %5, %9 : vector<8x64xi1>, vector<8x64xf32>
    %c0_7 = arith.constant 0 : index
    %c0_8 = arith.constant 0 : index
    %11 = vector.load %arg4[%c0_7, %c0_8] : memref<64x64xf32, #tpu.memory_space<vmem>>, vector<64x64xf32>
    %cst_9 = arith.constant dense<0.000000e+00> : vector<8x64xf32>
    %12 = tpu.matmul %10, %11, %cst_9 {dimension_numbers = #tpu.dot_dimension_numbers<[1], [0], [0], [1], [0, 0, 1, 1], [], []>} : vector<8x64xf32>, vector<64x64xf32>, vector<8x64xf32> -> vector<8x64xf32>
    %c0_10 = arith.constant 0 : index
    %c0_11 = arith.constant 0 : index
    %13 = vector.load %arg5[%c0_10, %c0_11] : memref<1x64xf32, #tpu.memory_space<vmem>>, vector<1x64xf32>
    %14 = vector.broadcast %13 : vector<1x64xf32> to vector<8x64xf32>
    %15 = arith.addf %12, %14 : vector<8x64xf32>
    %cst_12 = arith.constant 0.000000e+00 : f32
    %16 = vector.broadcast %cst_12 : f32 to vector<8x64xf32>
    %17 = arith.cmpf ogt, %15, %16 : vector<8x64xf32>
    %cst_13 = arith.constant 0.00999999977 : f32
    %18 = vector.broadcast %cst_13 : f32 to vector<8x64xf32>
    %19 = arith.mulf %18, %15 : vector<8x64xf32>
    %20 = arith.select %17, %15, %19 : vector<8x64xi1>, vector<8x64xf32>
    %c0_14 = arith.constant 0 : index
    %c0_15 = arith.constant 0 : index
    %21 = vector.load %arg6[%c0_14, %c0_15] : memref<64x256xf32, #tpu.memory_space<vmem>>, vector<64x256xf32>
    %cst_16 = arith.constant dense<0.000000e+00> : vector<8x256xf32>
    %22 = tpu.matmul %20, %21, %cst_16 {dimension_numbers = #tpu.dot_dimension_numbers<[1], [0], [0], [1], [0, 0, 1, 1], [], []>} : vector<8x64xf32>, vector<64x256xf32>, vector<8x256xf32> -> vector<8x256xf32>
    %c0_17 = arith.constant 0 : index
    %c0_18 = arith.constant 0 : index
    %23 = vector.load %arg7[%c0_17, %c0_18] : memref<1x256xf32, #tpu.memory_space<vmem>>, vector<1x256xf32>
    %24 = vector.broadcast %23 : vector<1x256xf32> to vector<8x256xf32>
    %25 = arith.addf %22, %24 : vector<8x256xf32>
    %cst_19 = arith.constant 0.000000e+00 : f32
    %26 = vector.broadcast %cst_19 : f32 to vector<8x256xf32>
    %27 = arith.cmpf ogt, %25, %26 : vector<8x256xf32>
    %cst_20 = arith.constant 0.00999999977 : f32
    %28 = vector.broadcast %cst_20 : f32 to vector<8x256xf32>
    %29 = arith.mulf %28, %25 : vector<8x256xf32>
    %30 = arith.select %27, %25, %29 : vector<8x256xi1>, vector<8x256xf32>
    %31 = vector.extract_strided_slice %30 {offsets = [0, 0], sizes = [8, 64], strides = [1, 1]} : vector<8x256xf32> to vector<8x64xf32>
    %c0_21 = arith.constant 0 : index
    %c0_22 = arith.constant 0 : index
    %32 = vector.load %arg13[%c0_21, %c0_22] : memref<32x64xf32, #tpu.memory_space<vmem>>, vector<8x64xf32>
    tpu.vector_store %arg13[%c0_21, %c0_22], %31 {strides = array<i32>} : memref<32x64xf32, #tpu.memory_space<vmem>>, vector<8x64xf32>,
    %33 = vector.extract_strided_slice %30 {offsets = [0, 64], sizes = [8, 64], strides = [1, 1]} : vector<8x256xf32> to vector<8x64xf32>
    %c8 = arith.constant 8 : index
    %c0_23 = arith.constant 0 : index
    %34 = vector.load %arg13[%c8, %c0_23] : memref<32x64xf32, #tpu.memory_space<vmem>>, vector<8x64xf32>
    tpu.vector_store %arg13[%c8, %c0_23], %33 {strides = array<i32>} : memref<32x64xf32, #tpu.memory_space<vmem>>, vector<8x64xf32>,
    %35 = vector.extract_strided_slice %30 {offsets = [0, 128], sizes = [8, 64], strides = [1, 1]} : vector<8x256xf32> to vector<8x64xf32>
    %c16 = arith.constant 16 : index
    %c0_24 = arith.constant 0 : index
    %36 = vector.load %arg13[%c16, %c0_24] : memref<32x64xf32, #tpu.memory_space<vmem>>, vector<8x64xf32>
    tpu.vector_store %arg13[%c16, %c0_24], %35 {strides = array<i32>} : memref<32x64xf32, #tpu.memory_space<vmem>>, vector<8x64xf32>,
    %37 = vector.extract_strided_slice %30 {offsets = [0, 192], sizes = [8, 64], strides = [1, 1]} : vector<8x256xf32> to vector<8x64xf32>
    %c24 = arith.constant 24 : index
    %c0_25 = arith.constant 0 : index
    %38 = vector.load %arg13[%c24, %c0_25] : memref<32x64xf32, #tpu.memory_space<vmem>>, vector<8x64xf32>
    tpu.vector_store %arg13[%c24, %c0_25], %37 {strides = array<i32>} : memref<32x64xf32, #tpu.memory_space<vmem>>, vector<8x64xf32>,
    %c0_26 = arith.constant 0 : index
    %c0_27 = arith.constant 0 : index
    %39 = vector.load %arg13[%c0_26, %c0_27] : memref<32x64xf32, #tpu.memory_space<vmem>>, vector<32x64xf32>
    %c0_28 = arith.constant 0 : index
    %c0_29 = arith.constant 0 : index
    %40 = vector.load %arg8[%c0_28, %c0_29] : memref<64x64xf32, #tpu.memory_space<vmem>>, vector<64x64xf32>
    %cst_30 = arith.constant dense<0.000000e+00> : vector<32x64xf32>
    %41 = tpu.matmul %39, %40, %cst_30 {dimension_numbers = #tpu.dot_dimension_numbers<[1], [0], [0], [1], [0, 0, 1, 1], [], []>} : vector<32x64xf32>, vector<64x64xf32>, vector<32x64xf32> -> vector<32x64xf32>
    %c0_31 = arith.constant 0 : index
    %c0_32 = arith.constant 0 : index
    %42 = vector.load %arg9[%c0_31, %c0_32] : memref<1x64xf32, #tpu.memory_space<vmem>>, vector<1x64xf32>
    %43 = vector.broadcast %42 : vector<1x64xf32> to vector<32x64xf32>
    %44 = arith.addf %41, %43 : vector<32x64xf32>
    %cst_33 = arith.constant 0.000000e+00 : f32
    %45 = vector.broadcast %cst_33 : f32 to vector<32x64xf32>
    %46 = arith.cmpf ogt, %44, %45 : vector<32x64xf32>
    %cst_34 = arith.constant 0.00999999977 : f32
    %47 = vector.broadcast %cst_34 : f32 to vector<32x64xf32>
    %48 = arith.mulf %47, %44 : vector<32x64xf32>
    %49 = arith.select %46, %44, %48 : vector<32x64xi1>, vector<32x64xf32>
    %c0_35 = arith.constant 0 : index
    %c0_36 = arith.constant 0 : index
    %50 = vector.load %arg10[%c0_35, %c0_36] : memref<64x256xf32, #tpu.memory_space<vmem>>, vector<64x256xf32>
    %cst_37 = arith.constant dense<0.000000e+00> : vector<32x256xf32>
    %51 = tpu.matmul %49, %50, %cst_37 {dimension_numbers = #tpu.dot_dimension_numbers<[1], [0], [0], [1], [0, 0, 1, 1], [], []>} : vector<32x64xf32>, vector<64x256xf32>, vector<32x256xf32> -> vector<32x256xf32>
    %c0_38 = arith.constant 0 : index
    %c0_39 = arith.constant 0 : index
    %52 = vector.load %arg11[%c0_38, %c0_39] : memref<1x256xf32, #tpu.memory_space<vmem>>, vector<1x256xf32>
    %53 = vector.broadcast %52 : vector<1x256xf32> to vector<32x256xf32>
    %54 = arith.addf %51, %53 : vector<32x256xf32>
    %cst_40 = arith.constant 0.000000e+00 : f32
    %55 = vector.broadcast %cst_40 : f32 to vector<32x256xf32>
    %56 = arith.cmpf ogt, %54, %55 : vector<32x256xf32>
    %cst_41 = arith.constant 0.00999999977 : f32
    %57 = vector.broadcast %cst_41 : f32 to vector<32x256xf32>
    %58 = arith.mulf %57, %54 : vector<32x256xf32>
    %59 = arith.select %56, %54, %58 : vector<32x256xi1>, vector<32x256xf32>
    %60 = vector.shape_cast %59 : vector<32x256xf32> to vector<4x8x256xf32>
    %c0_42 = arith.constant 0 : index
    %c0_43 = arith.constant 0 : index
    %c0_44 = arith.constant 0 : index
    %61 = vector.load %arg12[%c0_42, %c0_43, %c0_44] : memref<4x8x256xf32, #tpu.memory_space<vmem>>, vector<4x8x256xf32>
    tpu.vector_store %arg12[%c0_42, %c0_43, %c0_44], %60 {strides = array<i32>} : memref<4x8x256xf32, #tpu.memory_space<vmem>>, vector<4x8x256xf32>,
    return
  }
  func.func @transform_0(%arg0: i32) -> (i32, i32) {
    %c0_i32 = arith.constant 0 : i32
    %c0_i32_0 = arith.constant 0 : i32
    return %arg0, %c0_i32 : i32, i32
  }
  func.func @transform_1(%arg0: i32) -> (i32, i32) {
    %c0_i32 = arith.constant 0 : i32
    %c0_i32_0 = arith.constant 0 : i32
    %c0_i32_1 = arith.constant 0 : i32
    return %c0_i32, %c0_i32_0 : i32, i32
  }
  func.func @transform_2(%arg0: i32) -> (i32, i32) {
    %c0_i32 = arith.constant 0 : i32
    %c0_i32_0 = arith.constant 0 : i32
    %c0_i32_1 = arith.constant 0 : i32
    return %c0_i32, %c0_i32_0 : i32, i32
  }
  func.func @transform_3(%arg0: i32) -> (i32, i32) {
    %c0_i32 = arith.constant 0 : i32
    %c0_i32_0 = arith.constant 0 : i32
    %c0_i32_1 = arith.constant 0 : i32
    return %c0_i32, %c0_i32_0 : i32, i32
  }
  func.func @transform_4(%arg0: i32) -> (i32, i32) {
    %c0_i32 = arith.constant 0 : i32
    %c0_i32_0 = arith.constant 0 : i32
    %c0_i32_1 = arith.constant 0 : i32
    return %c0_i32, %c0_i32_0 : i32, i32
  }
  func.func @transform_5(%arg0: i32) -> (i32, i32) {
    %c0_i32 = arith.constant 0 : i32
    %c0_i32_0 = arith.constant 0 : i32
    %c0_i32_1 = arith.constant 0 : i32
    return %c0_i32, %c0_i32_0 : i32, i32
  }
  func.func @transform_6(%arg0: i32) -> (i32, i32) {
    %c0_i32 = arith.constant 0 : i32
    %c0_i32_0 = arith.constant 0 : i32
    %c0_i32_1 = arith.constant 0 : i32
    return %c0_i32, %c0_i32_0 : i32, i32
  }
  func.func @transform_7(%arg0: i32) -> (i32, i32) {
    %c0_i32 = arith.constant 0 : i32
    %c0_i32_0 = arith.constant 0 : i32
    %c0_i32_1 = arith.constant 0 : i32
    return %c0_i32, %c0_i32_0 : i32, i32
  }
  func.func @transform_8(%arg0: i32) -> (i32, i32) {
    %c0_i32 = arith.constant 0 : i32
    %c0_i32_0 = arith.constant 0 : i32
    %c0_i32_1 = arith.constant 0 : i32
    return %c0_i32, %c0_i32_0 : i32, i32
  }
  func.func @transform_9(%arg0: i32) -> (i32, i32) {
    %c0_i32 = arith.constant 0 : i32
    %c0_i32_0 = arith.constant 0 : i32
    %c0_i32_1 = arith.constant 0 : i32
    return %c0_i32, %c0_i32_0 : i32, i32
  }
  func.func @transform_10(%arg0: i32) -> (i32, i32) {
    %c0_i32 = arith.constant 0 : i32
    %c0_i32_0 = arith.constant 0 : i32
    %c0_i32_1 = arith.constant 0 : i32
    return %c0_i32, %c0_i32_0 : i32, i32
  }
  func.func @transform_11(%arg0: i32) -> (i32, i32, i32) {
    %c0_i32 = arith.constant 0 : i32
    %c0_i32_0 = arith.constant 0 : i32
    %c0_i32_1 = arith.constant 0 : i32
    return %c0_i32, %arg0, %c0_i32_0 : i32, i32, i32
  }
}

</mosaic_0001>

<bundles_post_ra>
// kernel: tpu_custom_call.1
= control target key start
LH: loop header
LB: loop body
LE: loop exit
PB: predicated region body
PF: predicated region fallthrough
CT: control target
= control target key end

     0   :  { %16 = vsyncpa [#allocation4], 0  ;;  %s1324_s0 = inlined_call_operand.hbm [shape: f32[8,256], index: 0, kind: input, shape index: {}]   ;;  %s1325_s1 = inlined_call_operand.vmem [shape: f32[256,64], index: 1, kind: input, shape index: {}]   ;;  %s1326_s2 = inlined_call_operand.vmem [shape: f32[1,64], index: 2, kind: input, shape index: {}]   ;;  %s1327_s3 = inlined_call_operand.vmem [shape: f32[64,64], index: 3, kind: input, shape index: {}]   ;;  %s1328_s4 = inlined_call_operand.vmem [shape: f32[1,64], index: 4, kind: input, shape index: {}]   ;;  %s1329_s5 = inlined_call_operand.vmem [shape: f32[64,256], index: 5, kind: input, shape index: {}]   ;;  %s1330_s6 = inlined_call_operand.vmem [shape: f32[1,256], index: 6, kind: input, shape index: {}]   ;;  %s1331_s7 = inlined_call_operand.vmem [shape: f32[64,64], index: 7, kind: input, shape index: {}]   ;;  %s1332_s8 = inlined_call_operand.vmem [shape: f32[1,64], index: 8, kind: input, shape index: {}]   ;;  %s1333_s9 = inlined_call_operand.vmem [shape: f32[64,256], index: 9, kind: input, shape index: {}]   ;;  %s1334_s10 = inlined_call_operand.vmem [shape: f32[1,256], index: 10, kind: input, shape index: {}]   ;;  %s1335_s11 = inlined_call_operand.hbm [shape: f32[4,8,256], index: 11, kind: output, shape index: {}]  }
   0x1   :  { %17 = vsyncpa [#allocation5], 0  ;;  %s941_s17 = smov [#allocation3]   ;;  %s893_s21 = scalar_lea.hbm %s1324_s0, 256 }
   0x2   :  { %s24_s18 = sshll.u32 %s941_s17, 4  ;;  %p894_p0 = scmp.ne.s32.totalorder %s1324_s0, %s893_s21  ;;  %s25_s18 = int_to_ptr.vmem [resolvable:$true] %s24_s18 }
   0x3   :  { %p897_p1 = scmp.lt.u32.totalorder %s893_s21, %s1324_s0 }
   0x5   :  { %p899_p2 = pnand %p897_p1, %p894_p0 }
   0x7   :  { %902 = shalt.err (!%p899_p2)
}
   0x8   :  { %s903_s26 = scalar_lea.vmem %s25_s18, 256  ;;  %p908_p4 = scmp.lt.s32.totalorder %s25_s18, %s25_s18 }
   0x9   :  { %p904_p3 = scmp.ne.s32.totalorder %s25_s18, %s903_s26  ;;  %p909_p5 = scmp.lt.s32.totalorder %s903_s26, %s903_s26 }
   0xb   :  { %p910_p6 = por %p909_p5, %p908_p4 }
   0xd   :  { %p911_p7 = pnand %p910_p6, %p904_p3 }
   0xf   :  { %914 = shalt.err (!%p911_p7)
}
  0x10   :  { %27 = dma.hbm_to_vmem [thread:$0]  %s1324_s0, 256, %s25_s18, [#allocation4]  }
  0x11   :  { %937 = dma.done.wait [#allocation4], 256  }
  0x12   :  { %938 = vsyncadd [#allocation4], 4294967040  ;;  %v942_v0 = vmov 0.0|0.0   ;;  %v69_v1 = vld [vmem:[%s1325_s1 + $0x80] sm:$0xff]  ;;  %v70_v2 = vld [vmem:[%s1325_s1 + $0x88] sm:$0xff]  ;;  %vm943_vm0 = vmmov 0  }
  0x13   :  { %825 = vmatprep.subr.bf16.mxu1 %v942_v0  ;;  %v53_v3 = vld [vmem:[%s1325_s1] sm:$0xff]  ;;  %v793_v4 = vpack.c.bf16 %v70_v2, %v69_v1  ;;  %v54_v5 = vld [vmem:[%s1325_s1 + $0x8] sm:$0xff]  ;;  %v71_v6 = vld [vmem:[%s1325_s1 + $0x90] sm:$0xff]  ;;  %v944_v63 = vmov 0.0   ;;  %vm180_vm2 = vcmask 523264   ;;  %s945_s17 = smov 64  }
  0x14   :  { %v72_v7 = vld [vmem:[%s1325_s1 + $0x98] sm:$0xff]  ;;  %v795_v8 = vpack.c.bf16 %v54_v5, %v53_v3  ;;  %v55_v10 = vld [vmem:[%s1325_s1 + $0x10] sm:$0xff]  ;;  %v73_v12 = vld [vmem:[%s1325_s1 + $0xa0] sm:$0xff]  ;;  %768 = vmatprep.mubr.msk.f32.mxu1 %vm943_vm0, %v944_v63 }
  0x15   :  { %v797_v9 = vpack.c.bf16 %v72_v7, %v71_v6  ;;  %v56_v11 = vld [vmem:[%s1325_s1 + $0x18] sm:$0xff]  ;;  %794 = vmatprep.subr.bf16.mxu0 %v793_v4  ;;  %v74_v13 = vld [vmem:[%s1325_s1 + $0xa8] sm:$0xff]  ;;  %v57_v16 = vld [vmem:[%s1325_s1 + $0x20] sm:$0xff] }
  0x16   :  { %796 = vmatpush3.bf16.msra.mxu0 %v795_v8  ;;  %v799_v14 = vpack.c.bf16 %v56_v11, %v55_v10  ;;  %v801_v15 = vpack.c.bf16 %v74_v13, %v73_v12  ;;  %v58_v17 = vld [vmem:[%s1325_s1 + $0x28] sm:$0xff]  ;;  %v75_v18 = vld [vmem:[%s1325_s1 + $0xb0] sm:$0xff]  ;;  %v76_v19 = vld [vmem:[%s1325_s1 + $0xb8] sm:$0xff] }
  0x17   :  { %798 = vmatprep.subr.bf16.mxu0 %v797_v9  ;;  %v803_v20 = vpack.c.bf16 %v58_v17, %v57_v16  ;;  %v805_v21 = vpack.c.bf16 %v76_v19, %v75_v18  ;;  %v59_v22 = vld [vmem:[%s1325_s1 + $0x30] sm:$0xff]  ;;  %v60_v23 = vld [vmem:[%s1325_s1 + $0x38] sm:$0xff]  ;;  %v77_v24 = vld [vmem:[%s1325_s1 + $0xc0] sm:$0xff] }
  0x18   :  { %v78_v25 = vld [vmem:[%s1325_s1 + $0xc8] sm:$0xff]  ;;  %v165_v27 = vld [vmem:[%s1327_s3] sm:$0xff]  ;;  %v807_v29 = vpack.c.bf16 %v60_v23, %v59_v22  ;;  %v167_v31 = vld [vmem:[%s1327_s3 + $0x10] sm:$0xff] }
  0x19   :  { %v52_v26 = vld [vmem:[#allocation3 + $0x8] sm:$0xff]  ;;  %v168_v32 = vld [vmem:[%s1327_s3 + $0x18] sm:$0xff]  ;;  %v809_v33 = vpack.c.bf16 %v78_v25, %v77_v24  ;;  %v61_v34 = vld [vmem:[%s1325_s1 + $0x40] sm:$0xff] }
  0x1a   :  { %800 = vmatpush3.bf16.msra.mxu0 %v799_v14  ;;  %156 = vmatprep.mubr.f32.mxu0 %v52_v26  ;;  %v166_v28 = vld [vmem:[%s1327_s3 + $0x8] sm:$0xff]  ;;  %v79_v36 = vld [vmem:[%s1325_s1 + $0xd0] sm:$0xff]  ;;  %v80_v37 = vld [vmem:[%s1325_s1 + $0xd8] sm:$0xff]  ;;  %v829_v38 = vpack.c.bf16 %v168_v32, %v167_v31 }
  0x1b   :  { %802 = vmatprep.subr.bf16.mxu0 %v801_v15  ;;  %v826_v30 = vpack.c.bf16 %v166_v28, %v165_v27  ;;  %v62_v35 = vld [vmem:[%s1325_s1 + $0x48] sm:$0xff]  ;;  %v813_v40 = vpack.c.bf16 %v80_v37, %v79_v36  ;;  %v63_v41 = vld [vmem:[%s1325_s1 + $0x50] sm:$0xff]  ;;  %v64_v42 = vld [vmem:[%s1325_s1 + $0x58] sm:$0xff] }
  0x1c   :  { %v811_v39 = vpack.c.bf16 %v62_v35, %v61_v34  ;;  %v81_v43 = vld [vmem:[%s1325_s1 + $0xe0] sm:$0xff]  ;;  %v82_v44 = vld [vmem:[%s1325_s1 + $0xe8] sm:$0xff]  ;;  %v815_v45 = vpack.c.bf16 %v64_v42, %v63_v41  ;;  %v83_v49 = vld [vmem:[%s1325_s1 + $0xf0] sm:$0xff] }
  0x1d   :  { %827 = vmatpush3.bf16.msra.mxu1 %v826_v30  ;;  %v817_v46 = vpack.c.bf16 %v82_v44, %v81_v43  ;;  %v65_v47 = vld [vmem:[%s1325_s1 + $0x60] sm:$0xff]  ;;  %v66_v48 = vld [vmem:[%s1325_s1 + $0x68] sm:$0xff]  ;;  %v84_v50 = vld [vmem:[%s1325_s1 + $0xf8] sm:$0xff]  ;;  %v275_v43 = vlaneseq }
  0x1e   :  { %804 = vmatpush3.bf16.msra.mxu0 %v803_v20  ;;  %828 = vmatprep.subr.bf16.mxu1 %v942_v0  ;;  %v819_v51 = vpack.c.bf16 %v66_v48, %v65_v47  ;;  %v821_v52 = vpack.c.bf16 %v84_v50, %v83_v49  ;;  %v67_v53 = vld [vmem:[%s1325_s1 + $0x70] sm:$0xff]  ;;  %v68_v54 = vld [vmem:[%s1325_s1 + $0x78] sm:$0xff]  ;;  %v51_v56 = vld [vmem:[#allocation3] sm:$0xff] }
  0x1f   :  { %806 = vmatprep.subr.bf16.mxu0 %v805_v21  ;;  %v823_v55 = vpack.c.bf16 %v68_v54, %v67_v53  ;;  %v169_v57 = vld [vmem:[%s1327_s3 + $0x20] sm:$0xff]  ;;  %v170_v58 = vld [vmem:[%s1327_s3 + $0x28] sm:$0xff]  ;;  %v171_v60 = vld [vmem:[%s1327_s3 + $0x30] sm:$0xff]  ;;  %v1216_v44 = vshrl.u32 %v275_v43, 7 }
  0x20   :  { %v832_v59 = vpack.c.bf16 %v170_v58, %v169_v57  ;;  %v172_v61 = vld [vmem:[%s1327_s3 + $0x38] sm:$0xff]  ;;  %v258_v1 = vld [vmem:[%s1329_s5 + $0x8] sm:$0xff]  ;;  %v683_v4 = vld [vmem:[%s1326_s2] ss:$0 sm:$0xff] }
  0x21   :  { %830 = vmatpush3.bf16.msra.mxu1 %v829_v38  ;;  %v835_v62 = vpack.c.bf16 %v172_v61, %v171_v60  ;;  %v257_v7 = vld [vmem:[%s1329_s5] sm:$0xff]  ;;  %v259_v8 = vld [vmem:[%s1329_s5 + $0x10] sm:$0xff]  ;;  %v262_v10 = vld [vmem:[%s1329_s5 + $0x28] sm:$0xff]  ;;  %v277_v48 = vsub.s32 0, %v1216_v44  ;;  %v281_v50 = vsub.s32 1, %v1216_v44 }
  0x22   :  { %808 = vmatpush3.bf16.msra.mxu0 %v807_v29  ;;  %831 = vmatprep.subr.bf16.mxu1 %v942_v0  ;;  %v264_v11 = vld [vmem:[%s1329_s5 + $0x38] sm:$0xff]  ;;  %v839_v13 = vpack.c.bf16 %v259_v8, %v257_v7  ;;  %v261_v15 = vld [vmem:[%s1329_s5 + $0x20] sm:$0xff]  ;;  %v263_v16 = vld [vmem:[%s1329_s5 + $0x30] sm:$0xff] }
  0x23   :  { %810 = vmatprep.subr.bf16.mxu0 %v809_v33  ;;  %v841_v14 = vpack.c.bf16 %v264_v11, %v262_v10  ;;  %v266_v18 = vld [vmem:[%s1329_s5 + $0x48] sm:$0xff]  ;;  %v268_v19 = vld [vmem:[%s1329_s5 + $0x58] sm:$0xff]  ;;  %v843_v20 = vpack.c.bf16 %v263_v16, %v261_v15  ;;  %v265_v22 = vld [vmem:[%s1329_s5 + $0x40] sm:$0xff] }
  0x24   :  { %v845_v21 = vpack.c.bf16 %v268_v19, %v266_v18  ;;  %v267_v23 = vld [vmem:[%s1329_s5 + $0x50] sm:$0xff]  ;;  %v270_v25 = vld [vmem:[%s1329_s5 + $0x68] sm:$0xff]  ;;  %v272_v26 = vld [vmem:[%s1329_s5 + $0x78] sm:$0xff] }
  0x25   :  { %833 = vmatpush3.bf16.msra.mxu1 %v832_v59  ;;  %v847_v24 = vpack.c.bf16 %v267_v23, %v265_v22  ;;  %v849_v27 = vpack.c.bf16 %v272_v26, %v270_v25  ;;  %v269_v28 = vld [vmem:[%s1329_s5 + $0x60] sm:$0xff]  ;;  %v271_v29 = vld [vmem:[%s1329_s5 + $0x70] sm:$0xff]  ;;  %v382_v38 = vld [vmem:[%s1331_s7 + $0x8] sm:$0xff] }
  0x26   :  { %812 = vmatpush3.bf16.msra.mxu0 %v811_v39  ;;  %834 = vmatprep.subr.bf16.mxu1 %v942_v0  ;;  %v260_v0 = vld [vmem:[%s1329_s5 + $0x18] sm:$0xff]  ;;  %v851_v30 = vpack.c.bf16 %v271_v29, %v269_v28  ;;  %v684_v31 = vld [vmem:[%s1328_s4] ss:$0 sm:$0xff]  ;;  %v383_v39 = vld [vmem:[%s1331_s7 + $0x10] sm:$0xff] }
  0x27   :  { %814 = vmatprep.subr.bf16.mxu0 %v813_v40  ;;  %v837_v2 = vpack.c.bf16 %v260_v0, %v258_v1  ;;  %v381_v37 = vld [vmem:[%s1331_s7] sm:$0xff]  ;;  %v384_v41 = vld [vmem:[%s1331_s7 + $0x18] sm:$0xff]  ;;  %v506_v1 = vld [vmem:[%s1333_s9 + $0x8] sm:$0xff] }
  0x28   :  { %v853_v40 = vpack.c.bf16 %v382_v38, %v381_v37  ;;  %v857_v42 = vpack.c.bf16 %v384_v41, %v383_v39  ;;  %v273_v49 = vld [vmem:[%s1330_s6] sm:$0x3]  ;;  %v508_v0 = vld [vmem:[%s1333_s9 + $0x18] sm:$0xff]  ;;  %v511_v11 = vld [vmem:[%s1333_s9 + $0x30] sm:$0xff] }
  0x29   :  { %836 = vmatpush3.bf16.msra.mxu1 %v835_v62  ;;  %v278_v54 = vrot.slane %v273_v49, %v277_v48  ;;  %v512_v7 = vld [vmem:[%s1333_s9 + $0x38] sm:$0xff]  ;;  %v509_v10 = vld [vmem:[%s1333_s9 + $0x20] sm:$0xff]  ;;  %v515_v23 = vld [vmem:[%s1333_s9 + $0x50] sm:$0xff] }
  0x2a   :  { %816 = vmatpush3.bf16.msra.mxu0 %v815_v45  ;;  %838 = vmatprep.subr.bf16.mxu1 %v837_v2  ;;  %v385_v45 = vld [vmem:[%s1331_s7 + $0x20] sm:$0xff]  ;;  %v518_v25 = vld [vmem:[%s1333_s9 + $0x68] sm:$0xff]  ;;  %v520_v26 = vld [vmem:[%s1333_s9 + $0x78] sm:$0xff] }
  0x2b   :  { %818 = vmatprep.subr.bf16.mxu0 %v817_v46  ;;  %v386_v46 = vld [vmem:[%s1331_s7 + $0x28] sm:$0xff]  ;;  %v505_v2 = vld [vmem:[%s1333_s9] sm:$0xff]  ;;  %v519_v29 = vld [vmem:[%s1333_s9 + $0x70] sm:$0xff] }
  0x2c   :  { %v861_v47 = vpack.c.bf16 %v386_v46, %v385_v45  ;;  %v513_v22 = vld [vmem:[%s1333_s9 + $0x40] sm:$0xff] }
  0x2d   :  { %v517_v28 = vld [vmem:[%s1333_s9 + $0x60] sm:$0xff] }
  0x2e   :  { %820 = vmatpush3.bf16.msra.mxu0 %v819_v51  ;;  %v387_v51 = vld [vmem:[%s1331_s7 + $0x30] sm:$0xff] }
  0x2f   :  { %822 = vmatprep.subr.bf16.mxu0 %v821_v52  ;;  %v388_v52 = vld [vmem:[%s1331_s7 + $0x38] sm:$0xff] }
  0x30   :  { %v865_v53 = vpack.c.bf16 %v388_v52, %v387_v51  ;;  %v521_v51 = vld [vmem:[%s1334_s10] sm:$0x3]  ;;  %s946_s10 = smov [#allocation6]  }
  0x31   :  { %v526_v52 = vrot.slane %v521_v51, %v277_v48  ;;  %s671_s19 = sshll.u32 %s946_s10, 4  ;;  %s672_s19 = int_to_ptr.vmem [resolvable:$true] %s671_s19 }
  0x32   :  { %824 = vmatpush3.bf16.msra.mxu0 %v823_v55  ;;  %v282_v55 = vrot.slane %v273_v49, %v281_v50  ;;  %s915_s20 = scalar_lea.vmem %s672_s19, 1024  ;;  %p920_p9 = scmp.lt.s32.totalorder %s672_s19, %s672_s19 }
  0x33   :  { %854 = vmatprep.subr.bf16.mxu0 %v853_v40  ;;  %p916_p8 = scmp.ne.s32.totalorder %s672_s19, %s915_s20  ;;  %p921_p10 = scmp.lt.s32.totalorder %s915_s20, %s915_s20 }
  0x35   :  { %157 = vmatmul.mubr.f32.vlgmr.msra.gmra.mrb[0].mxu0 %v51_v56  ;;  %p922_p11 = por %p921_p10, %p920_p9 }
  0x36   :  { %856 = vmatpush3.bf16.msra.mxu0 %v853_v40 }
  0x37   :  { %858 = vmatprep.subr.bf16.mxu0 %v857_v42  ;;  %p923_p12 = pnand %p922_p11, %p916_p8 }
  0x3a   :  { %860 = vmatpush3.bf16.msra.mxu0 %v857_v42 }
  0x3b   :  { %862 = vmatprep.subr.bf16.mxu0 %v861_v47 }
  0x3e   :  { %864 = vmatpush3.bf16.msra.mxu0 %v861_v47 }
  0x3f   :  { %866 = vmatprep.subr.bf16.mxu0 %v865_v53 }
  0x42   :  { %868 = vmatpush3.bf16.msra.mxu0 %v865_v53  ;;  %v530_v53 = vrot.slane %v521_v51, %v281_v50 }
 0x108   :  { %v728_v3 = vpop.f32.mrb[0].mxu0 }
 0x109   :  { %v729_v5 = vpop.f32.mrb[1].mxu0 }
 0x10a   :  { %v730_v6 = vadd.f32 %v729_v5, %v728_v3  ;;  %v507_v5 = vld [vmem:[%s1333_s9 + $0x10] sm:$0xff] }
 0x10b   :  { %v871_v8 = vpack.c.bf16 %v507_v5, %v505_v2 }
 0x10c   :  { %v159_v9 = vadd.f32 %v730_v6, %v683_v4  ;;  %v869_v4 = vpack.c.bf16 %v508_v0, %v506_v1  ;;  %v510_v6 = vld [vmem:[%s1333_s9 + $0x28] sm:$0xff] }
 0x10e   :  { %v163_v12 = vmul.f32 0.01, %v159_v9  ;;  %vm162_vm1 = vcmp.gt.f32.partialorder %v159_v9, 0.0 }
 0x110   :  { %v164_v17 = vsel %vm162_vm1, %v159_v9, %v163_v12  ;;  %v873_v9 = vpack.c.bf16 %v512_v7, %v510_v6  ;;  %v514_v12 = vld [vmem:[%s1333_s9 + $0x48] sm:$0xff] }
 0x111   :  { %769 = vmatmul.mubr.msk.f32.vlgmr.msra.gmra.mrb[0].mxu1 %vm180_vm2, %v164_v17 }
 0x112   :  { %840 = vmatpush1.bf16.msra.mxu1 %v839_v13  ;;  %352 = vmatprep.mubr.f32.mxu1 %v944_v63  ;;  %v516_v13 = vld [vmem:[%s1333_s9 + $0x58] sm:$0xff] }
 0x113   :  { %842 = vmatprep.subr.bf16.mxu1 %v841_v14  ;;  %v875_v14 = vpack.c.bf16 %v511_v11, %v509_v10  ;;  %v877_v15 = vpack.c.bf16 %v516_v13, %v514_v12 }
 0x116   :  { %844 = vmatpush1.bf16.msra.mxu1 %v843_v20 }
 0x117   :  { %846 = vmatprep.subr.bf16.mxu1 %v845_v21 }
 0x11a   :  { %848 = vmatpush1.bf16.msra.mxu1 %v847_v24  ;;  %v879_v24 = vpack.c.bf16 %v515_v23, %v513_v22 }
 0x11b   :  { %850 = vmatprep.subr.bf16.mxu1 %v849_v27  ;;  %v881_v27 = vpack.c.bf16 %v520_v26, %v518_v25 }
 0x11e   :  { %852 = vmatpush1.bf16.msra.mxu1 %v851_v30  ;;  %v883_v30 = vpack.c.bf16 %v519_v29, %v517_v28 }
 0x11f   :  { %870 = vmatprep.subr.bf16.mxu1 %v869_v4 }
 0x1e4   :  { %v250_v32 = vpop.f32.mrb[0].mxu1 }
 0x1e5   :  { %v251_v33 = vadd.f32 %v684_v31, %v250_v32  ;;  %v770_v34 = vpop.f32.mrb[1].mxu1  ;;  %v687_v31 = vld [vmem:[%s1332_s8] ss:$0 sm:$0xff] }
 0x1e7   :  { %vm254_vm3 = vcmp.gt.f32.partialorder %v251_v33, 0.0  ;;  %v255_v35 = vmul.f32 0.01, %v251_v33 }
 0x1e9   :  { %v256_v36 = vsel %vm254_vm3, %v251_v33, %v255_v35 }
 0x1ea   :  { %686 = vmatmul.mubr.msk.f32.vlgmr.msra.gmra.mrb[2].mxu1 %vm180_vm2, %v256_v36 }
 0x1eb   :  { %609 = vmatprep.mubr.f32.mxu1 %v944_v63  ;;  %872 = vmatpush1.bf16.msra.mxu1 %v871_v8 }
 0x1ec   :  { %874 = vmatprep.subr.bf16.mxu1 %v873_v9 }
 0x1ef   :  { %876 = vmatpush1.bf16.msra.mxu1 %v875_v14 }
 0x1f0   :  { %878 = vmatprep.subr.bf16.mxu1 %v877_v15 }
 0x1f3   :  { %880 = vmatpush1.bf16.msra.mxu1 %v879_v24 }
 0x1f4   :  { %882 = vmatprep.subr.bf16.mxu1 %v881_v27 }
 0x1f7   :  { %884 = vmatpush1.bf16.msra.mxu1 %v883_v30 }
 0x2bd   :  { %v354_v56 = vpop.f32.mrb[2].mxu1 }
 0x2be   :  { %v355_v57 = vadd.f32 %v354_v56, %v278_v54  ;;  %v356_v58 = vpop.f32.mrb[3].mxu1 }
 0x2bf   :  { %v357_v59 = vadd.f32 %v356_v58, %v282_v55 }
 0x2c0   :  { %vm359_vm4 = vcmp.gt.f32.partialorder %v355_v57, 0.0  ;;  %v361_v60 = vmul.f32 0.01, %v355_v57 }
 0x2c1   :  { %v362_v61 = vmul.f32 0.01, %v357_v59  ;;  %vm360_vm5 = vcmp.gt.f32.partialorder %v357_v59, 0.0 }
 0x2c2   :  { %v363_v62 = vsel %vm359_vm4, %v355_v57, %v361_v60 }
 0x2c3   :  { %367 = vrot.lane.b32.xlu0 %v363_v62, %s945_s17  ;;  %365 = vst.msk [vmem:[#allocation2] sm:$0xff] %vm180_vm2, %v363_v62  ;;  %v364_v3 = vsel %vm360_vm5, %v357_v59, %v362_v61 }
 0x2c4   :  { %371 = vst.msk [vmem:[#allocation2 + $0x10] sm:$0xff] %vm180_vm2, %v364_v3 }
 0x2c7   :  { %373 = vrot.lane.b32.xlu0 %v364_v3, %s945_s17 }
 0x2ca   :  { %v377_v16 = vld [vmem:[#allocation2] sm:$0xff] }
 0x2cb   :  { %787 = vmatprep.mubr.msk.f32.mxu0 %vm180_vm2, %v377_v16  ;;  %v379_v20 = vld [vmem:[#allocation2 + $0x10] sm:$0xff] }
 0x335   :  { %v368_v17 = vpop.permute.xlu0 %367 }
 0x336   :  { %370 = vst.msk [vmem:[#allocation2 + $0x8] sm:$0xff] %vm180_vm2, %v368_v17 }
 0x339   :  { %v374_v18 = vpop.permute.xlu0 %373 }
 0x33a   :  { %376 = vst.msk [vmem:[#allocation2 + $0x18] sm:$0xff] %vm180_vm2, %v374_v18 }
 0x33d   :  { %v378_v19 = vld [vmem:[#allocation2 + $0x8] sm:$0xff] }
 0x33e   :  { %788 = vmatmul.mubr.msk.f32.vlgmr.msra.gmra.mrb[2].mxu0 %vm180_vm2, %v378_v19 }
 0x33f   :  { %790 = vmatprep.mubr.msk.f32.mxu0 %vm180_vm2, %v379_v20 }
 0x341   :  { %v380_v21 = vld [vmem:[#allocation2 + $0x18] sm:$0xff] }
 0x342   :  { %791 = vmatmul.mubr.msk.f32.gmra.mrb[4].mxu0 %vm180_vm2, %v380_v21 }
 0x411   :  { %v789_v32 = vpop.f32.mrb[2].mxu0 }
 0x412   :  { %v474_v33 = vpop.f32.mrb[3].mxu0  ;;  %v480_v34 = vadd.f32 %v789_v32, %v687_v31 }
 0x413   :  { %v475_v35 = vadd.f32 %v687_v31, %v474_v33 }
 0x414   :  { %v498_v39 = vmul.f32 0.01, %v480_v34  ;;  %vm494_vm7 = vcmp.gt.f32.partialorder %v480_v34, 0.0 }
 0x415   :  { %vm493_vm6 = vcmp.gt.f32.partialorder %v475_v35, 0.0  ;;  %v497_v36 = vmul.f32 0.01, %v475_v35  ;;  %v792_v37 = vpop.f32.mrb[4].mxu0 }
 0x416   :  { %v484_v38 = vpop.f32.mrb[5].mxu0  ;;  %v490_v42 = vadd.f32 %v792_v37, %v687_v31  ;;  %v502_v45 = vsel %vm494_vm7, %v480_v34, %v498_v39 }
 0x417   :  { %v501_v40 = vsel %vm493_vm6, %v475_v35, %v497_v36  ;;  %v485_v41 = vadd.f32 %v687_v31, %v484_v38 }
 0x418   :  { %692 = vmatmul.mubr.msk.f32.vlgmr.msra.gmra.mrb[4].mxu1 %vm180_vm2, %v501_v40  ;;  %v500_v46 = vmul.f32 0.01, %v490_v42  ;;  %vm496_vm9 = vcmp.gt.f32.partialorder %v490_v42, 0.0 }
 0x419   :  { %615 = vmatprep.mubr.f32.mxu1 %v944_v63  ;;  %v499_v43 = vmul.f32 0.01, %v485_v41  ;;  %vm495_vm8 = vcmp.gt.f32.partialorder %v485_v41, 0.0 }
 0x41a   :  { %v504_v49 = vsel %vm496_vm9, %v490_v42, %v500_v46 }
 0x41b   :  { %v503_v47 = vsel %vm495_vm8, %v485_v41, %v499_v43 }
 0x41c   :  { %693 = vmatmul.mubr.msk.f32.gmra.mrb[6].mxu1 %vm180_vm2, %v502_v45 }
 0x41d   :  { %621 = vmatprep.mubr.f32.mxu1 %v944_v63 }
 0x420   :  { %694 = vmatmul.mubr.msk.f32.gmra.mrb[8].mxu1 %vm180_vm2, %v503_v47 }
 0x421   :  { %627 = vmatprep.mubr.f32.mxu1 %v944_v63 }
 0x424   :  { %695 = vmatmul.mubr.msk.f32.gmra.mrb[10].mxu1 %vm180_vm2, %v504_v49 }
 0x4eb   :  { %v611_v54 = vpop.f32.mrb[4].mxu1 }
 0x4ec   :  { %v612_v55 = vadd.f32 %v611_v54, %v526_v52  ;;  %v613_v56 = vpop.f32.mrb[5].mxu1 }
 0x4ed   :  { %v614_v57 = vadd.f32 %v613_v56, %v530_v53 }
 0x4ee   :  { %vm634_vm10 = vcmp.gt.f32.partialorder %v612_v55, 0.0  ;;  %v642_v58 = vmul.f32 0.01, %v612_v55 }
 0x4ef   :  { %vm635_vm11 = vcmp.gt.f32.partialorder %v614_v57, 0.0  ;;  %v643_v63 = vmul.f32 0.01, %v614_v57  ;;  %v617_v59 = vpop.f32.mrb[6].mxu1 }
 0x4f0   :  { %v650_v60 = vsel %vm634_vm10, %v612_v55, %v642_v58  ;;  %v618_v61 = vadd.f32 %v617_v59, %v526_v52  ;;  %v619_v62 = vpop.f32.mrb[7].mxu1 }
 0x4f1   :  { %658 = vst [vmem:[#allocation6] sm:$0xff] %v650_v60  ;;  %v651_v1 = vsel %vm635_vm11, %v614_v57, %v643_v63  ;;  %v620_v0 = vadd.f32 %v619_v62, %v530_v53 }
 0x4f2   :  { %659 = vst [vmem:[#allocation6 + $0x8] sm:$0xff] %v651_v1  ;;  %vm636_vm12 = vcmp.gt.f32.partialorder %v618_v61, 0.0  ;;  %v644_v48 = vmul.f32 0.01, %v618_v61 }
 0x4f3   :  { %vm637_vm13 = vcmp.gt.f32.partialorder %v620_v0, 0.0  ;;  %v645_v44 = vmul.f32 0.01, %v620_v0  ;;  %v623_v50 = vpop.f32.mrb[8].mxu1 }
 0x4f4   :  { %v652_v2 = vsel %vm636_vm12, %v618_v61, %v644_v48  ;;  %v624_v3 = vadd.f32 %v623_v50, %v526_v52  ;;  %v625_v4 = vpop.f32.mrb[9].mxu1 }
 0x4f5   :  { %660 = vst [vmem:[#allocation6 + $0x10] sm:$0xff] %v652_v2  ;;  %v653_v5 = vsel %vm637_vm13, %v620_v0, %v645_v44  ;;  %v626_v6 = vadd.f32 %v625_v4, %v530_v53 }
 0x4f6   :  { %661 = vst [vmem:[#allocation6 + $0x18] sm:$0xff] %v653_v5  ;;  %vm638_vm14 = vcmp.gt.f32.partialorder %v624_v3, 0.0  ;;  %v646_v7 = vmul.f32 0.01, %v624_v3 }
 0x4f7   :  { %vm639_vm15 = vcmp.gt.f32.partialorder %v626_v6, 0.0  ;;  %v647_v8 = vmul.f32 0.01, %v626_v6  ;;  %v629_v9 = vpop.f32.mrb[10].mxu1 }
 0x4f8   :  { %v654_v10 = vsel %vm638_vm14, %v624_v3, %v646_v7  ;;  %v630_v11 = vadd.f32 %v629_v9, %v526_v52  ;;  %v631_v12 = vpop.f32.mrb[11].mxu1 }
 0x4f9   :  { %662 = vst [vmem:[#allocation6 + $0x20] sm:$0xff] %v654_v10  ;;  %v655_v13 = vsel %vm639_vm15, %v626_v6, %v647_v8  ;;  %v632_v14 = vadd.f32 %v631_v12, %v530_v53 }
 0x4fa   :  { %663 = vst [vmem:[#allocation6 + $0x28] sm:$0xff] %v655_v13  ;;  %vm640_vm0 = vcmp.gt.f32.partialorder %v630_v11, 0.0  ;;  %v648_v15 = vmul.f32 0.01, %v630_v11 }
 0x4fb   :  { %vm641_vm1 = vcmp.gt.f32.partialorder %v632_v14, 0.0  ;;  %v649_v16 = vmul.f32 0.01, %v632_v14 }
 0x4fc   :  { %v656_v17 = vsel %vm640_vm0, %v630_v11, %v648_v15 }
 0x4fd   :  { %664 = vst [vmem:[#allocation6 + $0x30] sm:$0xff] %v656_v17  ;;  %v657_v18 = vsel %vm641_vm1, %v632_v14, %v649_v16 }
 0x4fe   :  { %665 = vst [vmem:[#allocation6 + $0x38] sm:$0xff] %v657_v18 }
 0x4ff   :  { %926 = shalt.err (!%p923_p12)
}
 0x500   :  { %s927_s21 = scalar_lea.hbm %s1335_s11, 1024 }
 0x501   :  { %p928_p13 = scmp.ne.s32.totalorder %s1335_s11, %s927_s21  ;;  %p931_p0 = scmp.lt.u32.totalorder %s927_s21, %s1335_s11 }
 0x503   :  { %p933_p1 = pnand %p931_p0, %p928_p13 }
 0x505   :  { %936 = shalt.err (!%p933_p1)
}
 0x506   :  { %s947_s25 = smov 256   ;;  %s948_s1 = smov 16  }
 0x507   :  { %677 = dma.vmem_to_hbm [thread:$0]  %s672_s19, 1024, %s1335_s11, [#allocation5], %s947_s25, %s947_s25, %s948_s1  }
 0x508   :  { %939 = dma.done.wait [#allocation5], 1024  }
 0x509   :  { %940 = vsyncadd [#allocation5], 4294966272 }
 0x50a   :  { %681 = vsyncpa [#allocation4], 1 }
 0x50b   :  { %682 = vsyncpa [#allocation5], 1 }

</bundles_post_ra>
